<compile_context>
chip_gen: v6e
topology: v6e:2x2x1
jax: 0.10.0
libtpu: 0.0.40
codegen_flags: <defaults>
</compile_context>

<pallas_src>
import numpy as np
import jax
import jax.numpy as jnp
from jax import lax
from jax.experimental import pallas as pl
from jax.experimental.pallas import tpu as pltpu


def _round_up(a: int, b: int) -> int:
    return ((a + b - 1) // b) * b


def _round_down(a: int, b: int) -> int:
    return (a // b) * b


# ----------------------------- kernel 1: projection --------------------------
def _score_kernel(x_ref, w_ref, o_ref):
    # (tm, F) @ (F, 1) on the MXU with f32 accumulation.  HIGHEST precision
    # keeps full-f32 results (the pass is HBM-bound, so the extra MXU passes
    # are free); on v5e/v6e the reduce would also hide under DMA, on v7x the
    # faster HBM makes the MXU route the right one.
    o_ref[...] = jnp.dot(
        x_ref[...], w_ref[...],
        preferred_element_type=jnp.float32,
        precision=jax.lax.Precision.HIGHEST)
    # TODO(synk): a lane-dense (tm//128, 128) score slab would avoid the
    # (tm, 1) masked vst's (mainly a v5e concern, 1 store slot); it needs an
    # in-kernel sublane->lane relayout that is fragile to lower, so the small
    # (tm, 1) store is kept for robustness.


def project_scores(x, w, *, tm=None):
    """score = (x @ w).reshape(-1), streamed over node tiles. No wrapper pad."""
    N, F = x.shape
    if N == 0:
        return jnp.zeros((0,), jnp.float32)
    w_col = w.reshape(F, 1).astype(x.dtype)

    if tm is None:
        # ~8 MiB of x per tile (16 MiB double-buffered): amortizes the ~0.35 us
        # per-grid-step overhead and sits well under the 32 MiB default scoped
        # VMEM (safe on v7x's 64 MiB physical VMEM too).
        bytes_per_row = x.dtype.itemsize * F
        tm = (8 * 1024 * 1024) // max(bytes_per_row, 1)
    # Keep at least ~8 grid steps when N allows it, so both v7x TensorCores
    # get work under dimension_semantics=("parallel",).
    tm = min(tm, pl.cdiv(N, 8))
    tm = max(8, _round_down(tm, 8))
    grid = pl.cdiv(N, tm)

    out = pl.pallas_call(
        _score_kernel,
        out_shape=jax.ShapeDtypeStruct((N, 1), jnp.float32),
        grid=(grid,),
        in_specs=[
            pl.BlockSpec((tm, F), lambda i: (i, 0)),   # stream x tiles (ragged tail OK)
            pl.BlockSpec((F, 1), lambda i: (0, 0)),    # w stays resident
        ],
        out_specs=pl.BlockSpec((tm, 1), lambda i: (i, 0)),
        compiler_params=pltpu.CompilerParams(
            dimension_semantics=("parallel",),         # shard over TCs (v7x)
            vmem_limit_bytes=32 * 1024 * 1024),
    )(x, w_col)
    return out.reshape(-1)


# ------------------------ kernel 2: edge membership mask ---------------------
def _edge_mask_kernel(idx_ref, ai_ref, aj_ref, o_ref):
    # idx_ref : (K,) int32 in SMEM (scalar prefetch) -- kept node indices
    # ai_ref  : (tr, 128) int32 source endpoints, sublane/lane-dense
    # aj_ref  : (tr, 128) int32 dest endpoints
    # o_ref   : (tr, 128) int32, 1 where both endpoints are kept
    ai = ai_ref[...]
    aj = aj_ref[...]
    num_kept = idx_ref.shape[0]

    def body(kk, carry):
        hit_i, hit_j = carry
        node = idx_ref[kk]                          # scalar SMEM read
        hit_i = jnp.where(ai == node, 1, hit_i)     # VPU compare + select, dense vregs
        hit_j = jnp.where(aj == node, 1, hit_j)
        return hit_i, hit_j

    zeros = jnp.zeros(ai.shape, jnp.int32)
    hit_i, hit_j = lax.fori_loop(0, num_kept, body, (zeros, zeros), unroll=8)
    o_ref[...] = hit_i * hit_j                      # mask_i & mask_j, unmasked store


def edge_mask(Ai, Aj, idx, *, tr=512):
    """(torch_isin(Ai, idx) & torch_isin(Aj, idx)) as bool[E].

    O(E*K) compare loop -- only dispatched for small K (see forward gating);
    large K uses the O(N+E) bitmap path instead.
    """
    E = int(Ai.shape[0])
    K = int(idx.shape[0])
    if E == 0 or K == 0:
        return jnp.zeros((E,), jnp.bool_)

    e_pad = _round_up(E, 128)
    n_rows = e_pad // 128

    def to_rows(a):
        a = a.astype(jnp.int32)
        if e_pad != E:
            # zero-padded tail bits are sliced off below, so no sentinel needed
            a = jnp.pad(a, (0, e_pad - E))
        return a.reshape(n_rows, 128)

    ai_rows = to_rows(Ai)   # no jnp.stack copy: Ai / Aj passed as two operands
    aj_rows = to_rows(Aj)

    # tr rows per tile = tr*128 edges (~tr*128*4 B per operand); block rows must
    # be a multiple of 8 unless the block spans the whole array.
    if n_rows <= tr:
        tr_blk = n_rows
    else:
        tr_blk = max(8, _round_down(tr, 8))
    grid = pl.cdiv(n_rows, tr_blk)

    grid_spec = pltpu.PrefetchScalarGridSpec(
        num_scalar_prefetch=1,                      # idx -> SMEM
        grid=(grid,),
        in_specs=[pl.BlockSpec((tr_blk, 128), lambda i, idx_ref: (i, 0)),
                  pl.BlockSpec((tr_blk, 128), lambda i, idx_ref: (i, 0))],
        out_specs=pl.BlockSpec((tr_blk, 128), lambda i, idx_ref: (i, 0)),
    )
    m = pl.pallas_call(
        _edge_mask_kernel,
        out_shape=jax.ShapeDtypeStruct((n_rows, 128), jnp.int32),
        grid_spec=grid_spec,
        compiler_params=pltpu.CompilerParams(
            dimension_semantics=("parallel",),
            vmem_limit_bytes=32 * 1024 * 1024),
    )(idx.astype(jnp.int32), ai_rows, aj_rows)
    return m.reshape(-1)[:E] > 0
    # TODO(synk): a Pallas O(N+E) bitmap variant (keep[N] resident in VMEM,
    # per-edge gather) would beat both paths for large K, but needs an
    # in-kernel dynamic / DMA gather; large K currently uses the XLA bitmap.


# ------------------------------ plain-XLA fallback ---------------------------
def _scores_xla(x, w):
    return (x @ w.reshape(-1, 1)).reshape(-1)


def _edge_mask_xla(Ai, Aj, idx, num_nodes):
    # O(N + E) membership bitmap.
    keep = jnp.zeros((num_nodes,), jnp.int32).at[idx].set(1)
    return (jnp.take(keep, Ai) * jnp.take(keep, Aj)) > 0


# --------------------------------- forward pass ------------------------------
_PALLAS_MIN_SCORE_ELEMS = 1 << 18   # below this, fixed pallas_call overhead dominates
_PALLAS_MIN_EDGES = 1 << 15         # edge kernel gated on its own workload (E, K)
_EDGE_PALLAS_MAX_K = 128            # O(E*K) loop is VALU-bound; bitmap wins past this
                                    # (also keeps the SMEM-prefetched idx tiny)


def topk_pooling_forward(x, adj, w, k, *, force_pallas=False):
    """Equivalent of TopKPooling.__forward_record.

    Returns (x_sliced, idx, edge_keep_mask).  Per the reference module, pooled
    features are NOT score-gated (it returns raw x[idx]).  The data-dependent
    edge compaction (Ai[mask], Aj[mask]) is done by the caller on host because
    the number of surviving edges is dynamic.  Note: lax.top_k may break ties
    in a different order than torch.topk.
    """
    Ai, Aj = adj
    N, F = x.shape

    # Score path: Pallas when the pass is big enough to amortize launch cost;
    # F < 128 auto-routes to XLA (v5e store-slot concern for the (tm,1) output).
    use_pallas_score = force_pallas or (x.size >= _PALLAS_MIN_SCORE_ELEMS and F >= 128)
    score = project_scores(x, w) if use_pallas_score else _scores_xla(x, w)

    kk = int(k * N)                                   # matches torch's int() truncation
    _, idx = lax.top_k(score, kk)                     # torch.topk(score, kk)
    x_sliced = jnp.take(x, idx, axis=0)               # x[idx]

    E = int(Ai.shape[0])
    if kk == 0 or E == 0:
        mask = jnp.zeros((E,), jnp.bool_)
    else:
        # Edge path gated on its OWN workload (E, K), not x.size.
        small_k = kk <= _EDGE_PALLAS_MAX_K
        use_pallas_edges = small_k and (force_pallas or E >= _PALLAS_MIN_EDGES)
        if use_pallas_edges:
            mask = edge_mask(Ai, Aj, idx)             # adj_filter mask (Pallas)
        else:
            mask = _edge_mask_xla(Ai, Aj, idx, N)     # O(N+E) bitmap
    return x_sliced, idx, mask


if __name__ == "__main__":
    N, F, E = 16, 32, 40
    k = 0.5

    key = jax.random.PRNGKey(0)
    kx, ke, kw = jax.random.split(key, 3)

    x = jax.random.normal(kx, (N, F), dtype=jnp.float32)
    edges = jax.random.randint(ke, (2, E), 0, N, dtype=jnp.int32)
    Ai, Aj = edges[0], edges[1]

    # nn.Linear(F, 1, bias=False) weight stored as [F, 1]
    w = jax.random.normal(kw, (F, 1), dtype=jnp.float32) / jnp.sqrt(jnp.float32(F))

    # force_pallas=True exercises the Pallas kernels even at these toy sizes
    # (the auto gate would route shapes this small to plain XLA).
    x_sliced, idx, mask = topk_pooling_forward(x, (Ai, Aj), w, k, force_pallas=True)
    jax.block_until_ready((x_sliced, idx, mask))

    # --- correctness checks vs plain-JAX / numpy reference -------------------
    score_ref = (np.asarray(x) @ np.asarray(w)).reshape(-1)
    np.testing.assert_allclose(np.asarray(project_scores(x, w)), score_ref,
                               rtol=1e-5, atol=1e-5)
    mask_ref = np.asarray(_edge_mask_xla(Ai, Aj, idx, N))
    assert np.array_equal(np.asarray(mask), mask_ref)

    # Dynamic-size edge slicing (Ai[mask], Aj[mask]) on host.
    Ai_np, Aj_np, m_np = np.asarray(Ai), np.asarray(Aj), np.asarray(mask)
    adj_sliced = (Ai_np[m_np], Aj_np[m_np])

    assert x_sliced.shape == (int(k * N), F)
    assert adj_sliced[0].shape == adj_sliced[1].shape

    # --- ragged-tile checks (N not multiple of tm, E not multiple of 128) ----
    N2, F2, E2 = 300, 40, 1000
    k2x, k2e, k2w = jax.random.split(jax.random.PRNGKey(1), 3)
    x2 = jax.random.normal(k2x, (N2, F2), dtype=jnp.float32)
    w2 = jax.random.normal(k2w, (F2, 1), dtype=jnp.float32)
    Ai2 = jax.random.randint(k2e, (E2,), 0, N2, dtype=jnp.int32)
    Aj2 = jax.random.randint(jax.random.fold_in(k2e, 1), (E2,), 0, N2, dtype=jnp.int32)
    idx2 = jnp.arange(60, dtype=jnp.int32) * 3

    np.testing.assert_allclose(
        np.asarray(project_scores(x2, w2)),
        (np.asarray(x2) @ np.asarray(w2)).reshape(-1),
        rtol=1e-5, atol=1e-5)
    assert np.array_equal(np.asarray(edge_mask(Ai2, Aj2, idx2)),
                          np.asarray(_edge_mask_xla(Ai2, Aj2, idx2, N2)))

    print("KERNEL_OK")
</pallas_src>

<mosaic_0001>
module attributes {stable_mosaic.version = 11 : i64} {
  func.func @_score_kernel(%arg0: i32, %arg1: memref<8x32xf32, #tpu.memory_space<vmem>>, %arg2: memref<32x1xf32, #tpu.memory_space<vmem>>, %arg3: memref<8x1xf32, #tpu.memory_space<vmem>>) attributes {dimension_semantics = [#tpu.dimension_semantics<parallel>], iteration_bounds = array<i64: 2>, scalar_prefetch = 0 : i64, scratch_operands = 0 : i64, tpu.core_type = #tpu.core_type<tc>, window_params = [{transform_indices = @transform_0, window_bounds = array<i64: 8, 32>}, {pipeline_mode = #tpu.pipeline_mode<synchronous>, transform_indices = @transform_1, window_bounds = array<i64: 32, 1>}, {transform_indices = @transform_2, window_bounds = array<i64: 8, 1>}]} {
    %c0 = arith.constant 0 : index
    %c0_0 = arith.constant 0 : index
    %0 = vector.load %arg1[%c0, %c0_0] : memref<8x32xf32, #tpu.memory_space<vmem>>, vector<8x32xf32>
    %c0_1 = arith.constant 0 : index
    %c0_2 = arith.constant 0 : index
    %1 = vector.load %arg2[%c0_1, %c0_2] : memref<32x1xf32, #tpu.memory_space<vmem>>, vector<32x1xf32>
    %cst = arith.constant dense<0.000000e+00> : vector<8x1xf32>
    %2 = tpu.matmul %0, %1, %cst {dimension_numbers = #tpu.dot_dimension_numbers<[1], [0], [0], [1], [0, 0, 1, 1], [], []>, precision = #tpu.contract_precision<fp32>} : vector<8x32xf32>, vector<32x1xf32>, vector<8x1xf32> -> vector<8x1xf32>
    %c0_3 = arith.constant 0 : index
    %c0_4 = arith.constant 0 : index
    %3 = vector.load %arg3[%c0_3, %c0_4] : memref<8x1xf32, #tpu.memory_space<vmem>>, vector<8x1xf32>
    tpu.vector_store %arg3[%c0_3, %c0_4], %2 {strides = array<i32>} : memref<8x1xf32, #tpu.memory_space<vmem>>, vector<8x1xf32>,
    return
  }
  func.func @transform_0(%arg0: i32) -> (i32, i32) {
    %c0_i32 = arith.constant 0 : i32
    %c0_i32_0 = arith.constant 0 : i32
    return %arg0, %c0_i32 : i32, i32
  }
  func.func @transform_1(%arg0: i32) -> (i32, i32) {
    %c0_i32 = arith.constant 0 : i32
    %c0_i32_0 = arith.constant 0 : i32
    %c0_i32_1 = arith.constant 0 : i32
    return %c0_i32, %c0_i32_0 : i32, i32
  }
  func.func @transform_2(%arg0: i32) -> (i32, i32) {
    %c0_i32 = arith.constant 0 : i32
    %c0_i32_0 = arith.constant 0 : i32
    return %arg0, %c0_i32 : i32, i32
  }
}

</mosaic_0001>

<bundles_post_ra>
// kernel: tpu_custom_call.1
= control target key start
LH: loop header
LB: loop body
LE: loop exit
PB: predicated region body
PF: predicated region fallthrough
CT: control target
= control target key end

     0   :  { %s828_s9 = smov 0   ;;  %s939_s0 = inlined_call_operand.vmem [shape: f32[16,32], index: 0, kind: input, shape index: {}]   ;;  %s940_s1 = inlined_call_operand.vmem [shape: f32[32,1], index: 1, kind: input, shape index: {}]   ;;  %s941_s2 = inlined_call_operand.vmem [shape: f32[16,1], index: 2, kind: output, shape index: {}]  }
   0x1 LB: > { %s688_s10 = sadd.s32 4294967295, %s809_s9   ;;  %p692_p0 = scmp.ge.s32.totalorder %s809_s9, 1  ;;  %s809_s9 = sphi %s828_s9, %s12_s9  }
   0x2   : > { %p111_p1 = scmp.lt.s32.totalorder %s809_s9, 3 }
   0x4   : > { %p112_p2 = pnand %p692_p0, %p111_p1 }
   0x5   : > { %p131_p3 = scmp.lt.s32.totalorder (!%p112_p2), %s688_s10, 1 }
   0x6   : > { %115 = sbr.rel (%p112_p2) target bundleno = 244 (0xf4), region = 28 }
   0xb   : > { %v143_v0 = vld [vmem:[%s940_s1 + $0x18] sm:$0xff]  ;;  %v142_v1 = vld [vmem:[%s940_s1 + $0x10] sm:$0xff]  ;;  %v141_v2 = vld [vmem:[%s940_s1 + $0x8] sm:$0xff]  ;;  %v811_v3 = vmov 0.0   ;;  %vm812_vm0 = vmmov 0   ;;  %s943_s10 = smov (!%p131_p3, %s688_s10), 1 }
   0xc   : > { %727 = vmatprep.subr.mxu0 %v811_v3  ;;  %v846_v4 = vand.u32 4294901760, %v143_v0  ;;  %738 = vmatprep.subr.mxu1 %v811_v3  ;;  %v849_v5 = vand.u32 4294901760, %v142_v1  ;;  %v851_v6 = vand.u32 4294901760, %v141_v2  ;;  %v140_v7 = vld [vmem:[%s940_s1] sm:$0xff]  ;;  %s693_s19 = sshll.u32 %s943_s10, 3  ;;  %vm144_vm1 = vcmask 261120  }
   0xd   : > { %v856_v8 = vand.u32 4294901760, %v140_v7  ;;  %735 = vmatprep.mubr.msk.f32.mxu0 %vm812_vm0, %v811_v3  ;;  %746 = vmatprep.mubr.msk.f32.mxu1 %vm812_vm0, %v811_v3  ;;  %s134_s22 = scalar_lea.vmem %s939_s0, %s693_s19  ;;  %s138_s25 = scalar_lea.vmem %s941_s2, %s693_s19  ;;  %vm633_vm2 = vcmask 7168  }
   0xe   : > { %728 = vmatpush3.msra.mxu0 %v846_v4  ;;  %v253_v9 = vsub.f32 %v143_v0, %v846_v4  ;;  %v867_v10 = vsub.f32 %v142_v1, %v849_v5  ;;  %v870_v11 = vsub.f32 %v141_v2, %v851_v6  ;;  %v139_v17 = vld [vmem:[%s134_s22] sm:$0xff] }
   0xf   : > { %729 = vmatprep.subr.mxu0 %v811_v3  ;;  %v874_v12 = vsub.f32 %v140_v7, %v856_v8  ;;  %v146_v21 = vsel %vm144_vm1, %v139_v17, 0 }
  0x10   : > { %v254_v13 = vand.u32 4294901760, %v253_v9  ;;  %730 = vmatpush3.msra.mxu0 %v849_v5  ;;  %v261_v14 = vand.u32 4294901760, %v867_v10  ;;  %v268_v15 = vand.u32 4294901760, %v870_v11  ;;  %v217_v22 = vand.u32 4294901760, %v146_v21 }
  0x11   : > { %731 = vmatprep.subr.mxu0 %v811_v3  ;;  %v275_v16 = vand.u32 4294901760, %v874_v12 }
  0x12   : > { %v255_v18 = vsub.f32 %v253_v9, %v254_v13  ;;  %v262_v19 = vsub.f32 %v867_v10, %v261_v14  ;;  %732 = vmatpush3.msra.mxu0 %v851_v6  ;;  %v269_v20 = vsub.f32 %v870_v11, %v268_v15  ;;  %v218_v26 = vsub.f32 %v146_v21, %v217_v22 }
  0x13   : > { %733 = vmatprep.subr.mxu0 %v811_v3  ;;  %v276_v25 = vsub.f32 %v874_v12, %v275_v16 }
  0x14   : > { %v256_v23 = vand.u32 4294901760, %v255_v18  ;;  %v263_v24 = vand.u32 4294901760, %v262_v19  ;;  %734 = vmatpush3.msra.mxu0 %v856_v8  ;;  %v270_v27 = vand.u32 4294901760, %v269_v20  ;;  %v219_v28 = vand.u32 4294901760, %v218_v26 }
  0x15   : > { %749 = vmatprep.subr.mxu0 %v811_v3  ;;  %v277_v29 = vand.u32 4294901760, %v276_v25 }
  0x16   : > { %739 = vmatpush3.msra.mxu1 %v256_v23  ;;  %v220_v30 = vsub.f32 %v218_v26, %v219_v28 }
  0x17   : > { %740 = vmatprep.subr.mxu1 %v811_v3 }
  0x18   : > { %741 = vmatpush3.msra.mxu1 %v263_v24  ;;  %v221_v31 = vand.u32 4294901760, %v220_v30 }
  0x19   : > { %742 = vmatprep.subr.mxu1 %v811_v3 }
  0x1a   : > { %743 = vmatpush3.msra.mxu1 %v270_v27  ;;  %736 = vmatmul.mubr.f32.vlgmr.msra.gmra.mxu0 %v221_v31 }
  0x1b   : > { %744 = vmatprep.subr.mxu1 %v811_v3  ;;  %750 = vmatpush3.msra.mxu0 %v253_v9 }
  0x1c   : > { %745 = vmatpush3.msra.mxu1 %v277_v29  ;;  %751 = vmatprep.subr.mxu0 %v811_v3 }
  0x1d   : > { %747 = vmatmul.mubr.f32.vlgmr.msra.gmra.mxu1 %v217_v22  ;;  %760 = vmatprep.subr.mxu1 %v811_v3 }
  0x1e   : > { %761 = vmatpush3.msra.mxu1 %v846_v4  ;;  %752 = vmatpush3.msra.mxu0 %v867_v10 }
  0x1f   : > { %762 = vmatprep.subr.mxu1 %v811_v3  ;;  %753 = vmatprep.subr.mxu0 %v811_v3 }
  0x20   : > { %763 = vmatpush3.msra.mxu1 %v849_v5  ;;  %754 = vmatpush3.msra.mxu0 %v870_v11 }
  0x21   : > { %764 = vmatprep.subr.mxu1 %v811_v3  ;;  %755 = vmatprep.subr.mxu0 %v811_v3 }
  0x22   : > { %765 = vmatpush3.msra.mxu1 %v851_v6  ;;  %756 = vmatpush3.msra.mxu0 %v874_v12 }
  0x23   : > { %757 = vmatprep.mubr.msk.f32.mxu0 %vm812_vm0, %v811_v3  ;;  %766 = vmatprep.subr.mxu1 %v811_v3 }
  0x24   : > { %758 = vmatmul.mubr.f32.vlgmr.msra.gmra.mxu0 %v218_v26  ;;  %767 = vmatpush3.msra.mxu1 %v856_v8 }
  0x25   : > { %768 = vmatprep.mubr.msk.f32.mxu1 %vm812_vm0, %v811_v3  ;;  %771 = vmatprep.subr.mxu0 %v811_v3 }
  0x26   : > { %769 = vmatmul.mubr.f32.vlgmr.msra.gmra.mxu1 %v219_v28  ;;  %772 = vmatpush3.msra.mxu0 %v254_v13 }
  0x27   : > { %782 = vmatprep.subr.mxu1 %v811_v3  ;;  %773 = vmatprep.subr.mxu0 %v811_v3 }
  0x28   : > { %783 = vmatpush3.msra.mxu1 %v846_v4  ;;  %774 = vmatpush3.msra.mxu0 %v261_v14 }
  0x29   : > { %784 = vmatprep.subr.mxu1 %v811_v3  ;;  %775 = vmatprep.subr.mxu0 %v811_v3 }
  0x2a   : > { %785 = vmatpush3.msra.mxu1 %v849_v5  ;;  %776 = vmatpush3.msra.mxu0 %v268_v15 }
  0x2b   : > { %786 = vmatprep.subr.mxu1 %v811_v3  ;;  %777 = vmatprep.subr.mxu0 %v811_v3 }
  0x2c   : > { %787 = vmatpush3.msra.mxu1 %v851_v6  ;;  %778 = vmatpush3.msra.mxu0 %v275_v16 }
  0x2d   : > { %779 = vmatprep.mubr.msk.f32.mxu0 %vm812_vm0, %v811_v3  ;;  %788 = vmatprep.subr.mxu1 %v811_v3 }
  0x2e   : > { %780 = vmatmul.mubr.f32.vlgmr.msra.gmra.mxu0 %v217_v22  ;;  %789 = vmatpush3.msra.mxu1 %v856_v8 }
  0x2f   : > { %790 = vmatprep.mubr.msk.f32.mxu1 %vm812_vm0, %v811_v3 }
  0x30   : > { %791 = vmatmul.mubr.f32.vlgmr.msra.gmra.mxu1 %v217_v22 }
  0xda   : > { %v223_v32 = vpop.f32.mrf.mxu0 }
  0xdc   : > { %v737_v34 = vpop.f32.mrf.mxu0 }
  0xdd   : > { %v314_v33 = vpop.f32.mrf.mxu1 }
  0xde   : > { %v315_v39 = vadd.f32 %v314_v33, %v223_v32 }
  0xdf   : > { %v748_v35 = vpop.f32.mrf.mxu1 }
  0xe4   : > { %v394_v36 = vpop.f32.mrf.mxu0 }
  0xe5   : > { %v395_v41 = vadd.f32 %v394_v36, %v315_v39 }
  0xe6   : > { %v471_v37 = vpop.f32.mrf.mxu1  ;;  %v759_v38 = vpop.f32.mrf.mxu0 }
  0xe7   : > { %v472_v42 = vadd.f32 %v471_v37, %v395_v41 }
  0xe8   : > { %v770_v40 = vpop.f32.mrf.mxu1 }
  0xee   : > { %v554_v43 = vpop.f32.mrf.mxu0 }
  0xef   : > { %v555_v44 = vadd.f32 %v554_v43, %v472_v42 }
  0xf0   : > { %v629_v45 = vpop.f32.mrf.mxu1  ;;  %v781_v46 = vpop.f32.mrf.mxu0 }
  0xf1   : > { %v630_v47 = vadd.f32 %v629_v45, %v555_v44 }
  0xf2   : > { %v792_v48 = vpop.f32.mrf.mxu1 }
  0xf3   : > { %634 = vst.msk [vmem:[%s138_s25] sm:$0xff] %vm633_vm2, %v630_v47 }
  0xf4 PF: > { %s12_s9 = sadd.s32 1, %s809_s9  }
  0xf5   : > { %p9_p4 = scmp.ge.s32.totalorder %s12_s9, 4  }
  0xf7   :  { %11 = sbr.rel (!%p9_p4) target bundleno = 1 (0x1), region = 58 }

</bundles_post_ra>
